<compile_context>
chip_gen: v7x
topology: tpu7x:2x2x1
jax: 0.10.0
libtpu: 0.0.40
codegen_flags: <defaults>
</compile_context>

<pallas_src>
import functools

import jax
import jax.numpy as jnp
from jax import lax
from jax.experimental import pallas as pl
from jax.experimental.pallas import tpu as pltpu


def _infonce_kernel(rgb_ref, spec_ref, row_loss_ref, m_sc, l_sc, d_sc, *,
                    inv_temp, mxu_dtype, use_safe_lse):
    i = pl.program_id(0)            # rgb row block (parallel)
    j = pl.program_id(1)            # spectral column block (reduction)
    ncols = pl.num_programs(1)

    rgb = rgb_ref[...].astype(jnp.float32)      # [TM, D]
    spec = spec_ref[...].astype(jnp.float32)    # [TN, D]

    # F.normalize(x, dim=1) == x / max(||x||, 1e-12) == x * rsqrt(max(||x||^2, 1e-24))
    eps2 = jnp.float32(1e-24)
    rgb_inv = lax.rsqrt(jnp.maximum(jnp.sum(rgb * rgb, axis=1, keepdims=True), eps2))
    spec_inv = lax.rsqrt(jnp.maximum(jnp.sum(spec * spec, axis=1, keepdims=True), eps2))
    # Fold 1/temperature into the rgb normalization (free: rescales a [TM,D]
    # pass that already happens, removes the [TM,TN] post-matmul multiply).
    rgb_s = rgb * (rgb_inv * jnp.float32(inv_temp))
    spec_n = spec * spec_inv

    @pl.when(j == 0)
    def _():
        if use_safe_lse:
            m_sc[...] = jnp.full_like(m_sc, -jnp.inf)
        l_sc[...] = jnp.zeros_like(l_sc)
        d_sc[...] = jnp.zeros_like(d_sc)

    # [TM, TN] scaled logits: NT contraction feeds the MXU directly (no .T copy).
    sim = lax.dot_general(
        rgb_s.astype(mxu_dtype), spec_n.astype(mxu_dtype),
        dimension_numbers=(((1,), (1,)), ((), ())),
        preferred_element_type=jnp.float32)

    if use_safe_lse:
        m_new = jnp.maximum(m_sc[...], jnp.max(sim, axis=1, keepdims=True))
        l_sc[...] = (jnp.exp(m_sc[...] - m_new) * l_sc[...]
                     + jnp.sum(jnp.exp(sim - m_new), axis=1, keepdims=True))
        m_sc[...] = m_new
    else:
        # Rows are unit-norm so |sim| <= 1/temperature (< 80); exp stays in f32 range.
        l_sc[...] = l_sc[...] + jnp.sum(jnp.exp(sim), axis=1, keepdims=True)

    @pl.when(j == i)
    def _():
        # Diagonal logits via a rowwise elementwise product (already scaled by
        # 1/temperature through rgb_s); no BxB iota mask needed.
        d_sc[...] = jnp.sum(rgb_s * spec_n, axis=1, keepdims=True)

    @pl.when(j == ncols - 1)
    def _():
        lse = (m_sc[...] + jnp.log(l_sc[...])) if use_safe_lse else jnp.log(l_sc[...])
        row_loss_ref[...] = lse - d_sc[...]


def _pick_tile(b):
    # Square logit tiles; prefer MXU-friendly 256 (v6e/v7x) then 128 (v5e),
    # otherwise fall back to a single full-extent block (small batches).
    for t in (256, 128):
        if b % t == 0:
            return t
    return b


def infonce_cross_modal_loss(rgb_features, spectral_features, temperature=0.07):
    """Pallas TPU implementation of InfoNCECrossModalLoss.forward."""
    if spectral_features is None:
        return jnp.float32(0.0)

    B, D = rgb_features.shape
    assert spectral_features.shape == (B, D)

    tile = _pick_tile(B)                        # TM == TN (square tiles)
    nrb = B // tile

    inv_temp = 1.0 / float(temperature)
    use_safe_lse = inv_temp > 80.0              # only keep row-max pass if exp could overflow
    bf16_in = (rgb_features.dtype == jnp.bfloat16
               and spectral_features.dtype == jnp.bfloat16)
    mxu_dtype = jnp.bfloat16 if bf16_in else jnp.float32

    kernel = functools.partial(_infonce_kernel, inv_temp=inv_temp,
                               mxu_dtype=mxu_dtype, use_safe_lse=use_safe_lse)

    row_loss = pl.pallas_call(
        kernel,
        out_shape=jax.ShapeDtypeStruct((B, 1), jnp.float32),
        grid_spec=pltpu.PrefetchScalarGridSpec(
            num_scalar_prefetch=0,
            grid=(nrb, nrb),
            in_specs=[
                pl.BlockSpec((tile, D), lambda i, j: (i, 0)),   # rgb rows (resident over j)
                pl.BlockSpec((tile, D), lambda i, j: (j, 0)),   # spectral cols (streamed)
            ],
            out_specs=pl.BlockSpec((tile, 1), lambda i, j: (i, 0)),
            scratch_shapes=[
                pltpu.VMEM((tile, 1), jnp.float32),   # running row max
                pltpu.VMEM((tile, 1), jnp.float32),   # running sum(exp)
                pltpu.VMEM((tile, 1), jnp.float32),   # diagonal logits
            ]),
        compiler_params=pltpu.CompilerParams(
            dimension_semantics=("parallel", "arbitrary")),
    )(rgb_features, spectral_features)

    # CrossEntropyLoss default reduction = mean over the batch.
    return jnp.sum(row_loss) * jnp.float32(1.0 / B)


def _reference_loss(rgb, spec, temperature=0.07):
    """Pure-JAX reference mirroring the PyTorch module."""
    rgb = rgb / jnp.maximum(jnp.linalg.norm(rgb, axis=1, keepdims=True), 1e-12)
    spec = spec / jnp.maximum(jnp.linalg.norm(spec, axis=1, keepdims=True), 1e-12)
    sim = jnp.matmul(rgb, spec.T, precision=lax.Precision.HIGHEST) / temperature
    lse = jax.scipy.special.logsumexp(sim, axis=1)
    diag = jnp.diagonal(sim)
    return jnp.mean(lse - diag)


if __name__ == "__main__":
    key = jax.random.PRNGKey(0)
    k1, k2 = jax.random.split(key)
    B, D = 8, 32
    rgb_features = jax.random.normal(k1, (B, D), dtype=jnp.float32)
    spectral_features = jax.random.normal(k2, (B, D), dtype=jnp.float32)

    loss = infonce_cross_modal_loss(rgb_features, spectral_features,
                                    temperature=0.07)
    loss = jax.block_until_ready(loss)

    ref = _reference_loss(rgb_features, spectral_features, temperature=0.07)
    assert jnp.allclose(loss, ref, rtol=1e-4, atol=1e-4), (loss, ref)

    print("KERNEL_OK")
</pallas_src>

<mosaic_0001>
module attributes {stable_mosaic.version = 11 : i64} {
  func.func @_infonce_kernel(%arg0: i32, %arg1: i32, %arg2: memref<8x32xf32, #tpu.memory_space<vmem>>, %arg3: memref<8x32xf32, #tpu.memory_space<vmem>>, %arg4: memref<8x1xf32, #tpu.memory_space<vmem>>, %arg5: memref<8x1xf32, #tpu.memory_space<vmem>>, %arg6: memref<8x1xf32, #tpu.memory_space<vmem>>, %arg7: memref<8x1xf32, #tpu.memory_space<vmem>>) attributes {dimension_semantics = [#tpu.dimension_semantics<parallel>, #tpu.dimension_semantics<arbitrary>], iteration_bounds = array<i64: 1, 1>, scalar_prefetch = 0 : i64, scratch_operands = 3 : i64, tpu.core_type = #tpu.core_type<tc>, window_params = [{transform_indices = @transform_0, window_bounds = array<i64: 8, 32>}, {transform_indices = @transform_1, window_bounds = array<i64: 8, 32>}, {transform_indices = @transform_2, window_bounds = array<i64: 8, 1>}]} {
    %c0 = arith.constant 0 : index
    %c0_0 = arith.constant 0 : index
    %0 = vector.load %arg2[%c0, %c0_0] : memref<8x32xf32, #tpu.memory_space<vmem>>, vector<8x32xf32>
    %c0_1 = arith.constant 0 : index
    %c0_2 = arith.constant 0 : index
    %1 = vector.load %arg3[%c0_1, %c0_2] : memref<8x32xf32, #tpu.memory_space<vmem>>, vector<8x32xf32>
    %2 = arith.mulf %0, %0 : vector<8x32xf32>
    %cst = arith.constant dense<0.000000e+00> : vector<8xf32>
    %3 = vector.multi_reduction <add>, %2, %cst [1] : vector<8x32xf32> to vector<8xf32>
    %4 = vector.shape_cast %3 : vector<8xf32> to vector<8x1xf32>
    %cst_3 = arith.constant 1.000000e-24 : f32
    %5 = vector.broadcast %cst_3 : f32 to vector<8x1xf32>
    %6 = arith.maximumf %4, %5 : vector<8x1xf32>
    %7 = math.rsqrt %6 : vector<8x1xf32>
    %8 = arith.mulf %1, %1 : vector<8x32xf32>
    %cst_4 = arith.constant dense<0.000000e+00> : vector<8xf32>
    %9 = vector.multi_reduction <add>, %8, %cst_4 [1] : vector<8x32xf32> to vector<8xf32>
    %10 = vector.shape_cast %9 : vector<8xf32> to vector<8x1xf32>
    %cst_5 = arith.constant 1.000000e-24 : f32
    %11 = vector.broadcast %cst_5 : f32 to vector<8x1xf32>
    %12 = arith.maximumf %10, %11 : vector<8x1xf32>
    %13 = math.rsqrt %12 : vector<8x1xf32>
    %cst_6 = arith.constant 14.2857141 : f32
    %14 = vector.broadcast %cst_6 : f32 to vector<8x1xf32>
    %15 = arith.mulf %7, %14 : vector<8x1xf32>
    %16 = vector.broadcast %15 : vector<8x1xf32> to vector<8x32xf32>
    %17 = arith.mulf %0, %16 : vector<8x32xf32>
    %18 = vector.broadcast %13 : vector<8x1xf32> to vector<8x32xf32>
    %19 = arith.mulf %1, %18 : vector<8x32xf32>
    %c0_i32 = arith.constant 0 : i32
    %20 = arith.cmpi eq, %arg1, %c0_i32 : i32
    %21 = arith.extui %20 : i1 to i32
    %c0_i32_7 = arith.constant 0 : i32
    %22 = arith.cmpi ne, %21, %c0_i32_7 : i32
    scf.if %22 {
      %cst_17 = arith.constant 0.000000e+00 : f32
      %36 = vector.broadcast %cst_17 : f32 to vector<8x1xf32>
      %c0_18 = arith.constant 0 : index
      %c0_19 = arith.constant 0 : index
      %37 = vector.load %arg6[%c0_18, %c0_19] : memref<8x1xf32, #tpu.memory_space<vmem>>, vector<8x1xf32>
      tpu.vector_store %arg6[%c0_18, %c0_19], %36 {strides = array<i32>} : memref<8x1xf32, #tpu.memory_space<vmem>>, vector<8x1xf32>,
      %cst_20 = arith.constant 0.000000e+00 : f32
      %38 = vector.broadcast %cst_20 : f32 to vector<8x1xf32>
      %c0_21 = arith.constant 0 : index
      %c0_22 = arith.constant 0 : index
      %39 = vector.load %arg7[%c0_21, %c0_22] : memref<8x1xf32, #tpu.memory_space<vmem>>, vector<8x1xf32>
      tpu.vector_store %arg7[%c0_21, %c0_22], %38 {strides = array<i32>} : memref<8x1xf32, #tpu.memory_space<vmem>>, vector<8x1xf32>,
    } else {
    }
    %cst_8 = arith.constant dense<0.000000e+00> : vector<8x8xf32>
    %23 = tpu.matmul %17, %19, %cst_8 {dimension_numbers = #tpu.dot_dimension_numbers<[1], [1], [0], [0], [0, 0, 1, 0], [], []>} : vector<8x32xf32>, vector<8x32xf32>, vector<8x8xf32> -> vector<8x8xf32>
    %c0_9 = arith.constant 0 : index
    %c0_10 = arith.constant 0 : index
    %24 = vector.load %arg6[%c0_9, %c0_10] : memref<8x1xf32, #tpu.memory_space<vmem>>, vector<8x1xf32>
    %25 = math.exp %23 : vector<8x8xf32>
    %cst_11 = arith.constant dense<0.000000e+00> : vector<8xf32>
    %26 = vector.multi_reduction <add>, %25, %cst_11 [1] : vector<8x8xf32> to vector<8xf32>
    %27 = vector.shape_cast %26 : vector<8xf32> to vector<8x1xf32>
    %28 = arith.addf %24, %27 : vector<8x1xf32>
    %c0_12 = arith.constant 0 : index
    %c0_13 = arith.constant 0 : index
    %29 = vector.load %arg6[%c0_12, %c0_13] : memref<8x1xf32, #tpu.memory_space<vmem>>, vector<8x1xf32>
    tpu.vector_store %arg6[%c0_12, %c0_13], %28 {strides = array<i32>} : memref<8x1xf32, #tpu.memory_space<vmem>>, vector<8x1xf32>,
    %30 = arith.cmpi eq, %arg1, %arg0 : i32
    %31 = arith.extui %30 : i1 to i32
    %c0_i32_14 = arith.constant 0 : i32
    %32 = arith.cmpi ne, %31, %c0_i32_14 : i32
    scf.if %32 {
      %36 = arith.mulf %17, %19 : vector<8x32xf32>
      %cst_17 = arith.constant dense<0.000000e+00> : vector<8xf32>
      %37 = vector.multi_reduction <add>, %36, %cst_17 [1] : vector<8x32xf32> to vector<8xf32>
      %38 = vector.shape_cast %37 : vector<8xf32> to vector<8x1xf32>
      %c0_18 = arith.constant 0 : index
      %c0_19 = arith.constant 0 : index
      %39 = vector.load %arg7[%c0_18, %c0_19] : memref<8x1xf32, #tpu.memory_space<vmem>>, vector<8x1xf32>
      tpu.vector_store %arg7[%c0_18, %c0_19], %38 {strides = array<i32>} : memref<8x1xf32, #tpu.memory_space<vmem>>, vector<8x1xf32>,
    } else {
    }
    %c0_i32_15 = arith.constant 0 : i32
    %33 = arith.cmpi eq, %arg1, %c0_i32_15 : i32
    %34 = arith.extui %33 : i1 to i32
    %c0_i32_16 = arith.constant 0 : i32
    %35 = arith.cmpi ne, %34, %c0_i32_16 : i32
    scf.if %35 {
      %c0_17 = arith.constant 0 : index
      %c0_18 = arith.constant 0 : index
      %36 = vector.load %arg6[%c0_17, %c0_18] : memref<8x1xf32, #tpu.memory_space<vmem>>, vector<8x1xf32>
      %37 = math.log %36 : vector<8x1xf32>
      %c0_19 = arith.constant 0 : index
      %c0_20 = arith.constant 0 : index
      %38 = vector.load %arg7[%c0_19, %c0_20] : memref<8x1xf32, #tpu.memory_space<vmem>>, vector<8x1xf32>
      %39 = arith.subf %37, %38 : vector<8x1xf32>
      %c0_21 = arith.constant 0 : index
      %c0_22 = arith.constant 0 : index
      %40 = vector.load %arg4[%c0_21, %c0_22] : memref<8x1xf32, #tpu.memory_space<vmem>>, vector<8x1xf32>
      tpu.vector_store %arg4[%c0_21, %c0_22], %39 {strides = array<i32>} : memref<8x1xf32, #tpu.memory_space<vmem>>, vector<8x1xf32>,
    } else {
    }
    return
  }
  func.func @transform_0(%arg0: i32, %arg1: i32) -> (i32, i32) {
    %c0_i32 = arith.constant 0 : i32
    %c0_i32_0 = arith.constant 0 : i32
    return %arg0, %c0_i32 : i32, i32
  }
  func.func @transform_1(%arg0: i32, %arg1: i32) -> (i32, i32) {
    %c0_i32 = arith.constant 0 : i32
    %c0_i32_0 = arith.constant 0 : i32
    return %arg1, %c0_i32 : i32, i32
  }
  func.func @transform_2(%arg0: i32, %arg1: i32) -> (i32, i32) {
    %c0_i32 = arith.constant 0 : i32
    %c0_i32_0 = arith.constant 0 : i32
    return %arg0, %c0_i32 : i32, i32
  }
}

</mosaic_0001>

<bundles_post_ra>
// kernel: tpu_custom_call.1
= control target key start
LH: loop header
LB: loop body
LE: loop exit
PB: predicated region body
PF: predicated region fallthrough
CT: control target
= control target key end

     0   :  { %7 = vsyncpa [#allocation6], 0  ;;  %s295_s0 = inlined_call_operand.hbm [shape: f32[8,32], index: 0, kind: input, shape index: {}]   ;;  %s296_s1 = inlined_call_operand.hbm [shape: f32[8,32], index: 1, kind: input, shape index: {}]   ;;  %s297_s2 = inlined_call_operand.vmem [shape: f32[8,1], index: 2, kind: output, shape index: {}]  }
   0x1   :  { %8 = vsyncpa [#allocation8], 0  ;;  %s239_s9 = smov [#allocation5]   ;;  %s240_s11 = smov [#allocation7]  }
   0x2   :  { %s15_s10 = sshll.u32 %s239_s9, 4  ;;  %s25_s12 = sshll.u32 %s240_s11, 4  ;;  %s16_s10 = int_to_ptr.vmem [resolvable:$true] %s15_s10  ;;  %s26_s12 = int_to_ptr.vmem [resolvable:$true] %s25_s12 }
   0x3   :  { %s191_s15 = scalar_lea.hbm %s295_s0, 128 }
   0x4   :  { %p192_p0 = scmp.ne.s32.totalorder %s295_s0, %s191_s15  ;;  %p195_p1 = scmp.lt.u32.totalorder %s191_s15, %s295_s0 }
   0x6   :  { %p197_p2 = pnand %p195_p1, %p192_p0 }
   0x8   :  { %200 = shalt.err (!%p197_p2)
}
   0x9   :  { %s201_s20 = scalar_lea.vmem %s16_s10, 128  ;;  %p206_p4 = scmp.lt.s32.totalorder %s16_s10, %s16_s10 }
   0xa   :  { %p202_p3 = scmp.ne.s32.totalorder %s16_s10, %s201_s20  ;;  %p207_p5 = scmp.lt.s32.totalorder %s201_s20, %s201_s20 }
   0xc   :  { %p208_p6 = por %p207_p5, %p206_p4 }
   0xe   :  { %p209_p7 = pnand %p208_p6, %p202_p3 }
  0x10   :  { %212 = shalt.err (!%p209_p7)
}
  0x11   :  { %18 = dma.hbm_to_vmem [thread:$0]  %s295_s0, 128, %s16_s10, [#allocation6]  }
  0x12   :  { %s213_s25 = scalar_lea.hbm %s296_s1, 128 }
  0x13   :  { %p214_p8 = scmp.ne.s32.totalorder %s296_s1, %s213_s25  ;;  %p217_p9 = scmp.lt.u32.totalorder %s213_s25, %s296_s1 }
  0x15   :  { %p219_p10 = pnand %p217_p9, %p214_p8 }
  0x17   :  { %222 = shalt.err (!%p219_p10)
}
  0x18   :  { %s223_s30 = scalar_lea.vmem %s26_s12, 128  ;;  %p228_p12 = scmp.lt.s32.totalorder %s26_s12, %s26_s12 }
  0x19   :  { %p224_p11 = scmp.ne.s32.totalorder %s26_s12, %s223_s30  ;;  %p229_p13 = scmp.lt.s32.totalorder %s223_s30, %s223_s30 }
  0x1b   :  { %p230_p0 = por %p229_p13, %p228_p12 }
  0x1d   :  { %p231_p1 = pnand %p230_p0, %p224_p11 }
  0x1f   :  { %234 = shalt.err (!%p231_p1)
}
  0x20   :  { %28 = dma.hbm_to_vmem [thread:$0]  %s296_s1, 128, %s26_s12, [#allocation8]  }
  0x21   :  { %235 = dma.done.wait [#allocation6], 128  }
  0x22   :  { %236 = vsyncadd [#allocation6], 4294967168 }
  0x23   :  { %237 = dma.done.wait [#allocation8], 128  }
  0x24   :  { %238 = vsyncadd [#allocation8], 4294967168  ;;  %v36_v0 = vld [vmem:[#allocation7] sm:$0xff]  ;;  %vm38_vm0 = vcmask 261120   ;;  %v35_v1 = vld [vmem:[#allocation5] sm:$0xff]  ;;  %v241_v6 = vmov 0.0  }
  0x25   :  { %v44_v2 = vmul.f32 %v36_v0, %v36_v0  ;;  %v37_v3 = vmul.f32 %v35_v1, %v35_v1  ;;  %174 = vmatprep.subr.mxu0 %v241_v6  ;;  %vm57_vm1 = vcmask 7168   ;;  %vm242_vm2 = vmmov 0  }
  0x26   :  { %58 = vst.msk [vmem:[#allocation3] sm:$0xff] %vm57_vm1, %v241_v6  ;;  %59 = vst.msk [vmem:[#allocation4] sm:$0xff] %vm57_vm1, %v241_v6  ;;  %176 = vmatprep.mubr.msk.f32.mxu0 %vm242_vm2, %v241_v6  ;;  %vm139_vm3 = vcmask 64512  }
  0x27   :  { %v45_v4 = vsel %vm38_vm0, %v44_v2, 0.0  ;;  %v39_v5 = vsel %vm38_vm0, %v37_v3, 0.0 }
  0x28   :  { %46 = vadd.xlane.f32.xlu0 %v45_v4 }
  0x2c   :  { %40 = vadd.xlane.f32.xlu0 %v39_v5 }
  0x2d   :  { %v136_v23 = vld [vmem:[#allocation3] sm:$0xff] }
  0xb5   :  { %v47_v7 = vpop.xlane.xlu0 %46 }
  0xb6   :  { %v48_v8 = vmax.f32 %v47_v7, 1e-24 }
  0xb8   :  { %183 = vrsqrt.f32 %v48_v8 }
  0xb9   :  { %v41_v9 = vpop.xlane.xlu0 %40 }
  0xba   :  { %v42_v10 = vmax.f32 %v41_v9, 1e-24 }
  0xbc   :  { %185 = vrsqrt.f32 %v42_v10 }
  0xc2   :  { %v184_v11 = vpop.eup %183 }
  0xc3   :  { %v52_v12 = vmul.f32 %v184_v11, %v36_v0 }
  0xc5   :  { %175 = vmatpush3.xpose.msk.msra.mxu0 %vm38_vm0, %v52_v12 }
  0xc6   :  { %v186_v13 = vpop.eup %185 }
  0xc7   :  { %v50_v14 = vmul.f32 14.285714, %v186_v13 }
  0xc9   :  { %v51_v15 = vmul.f32 %v50_v14, %v35_v1 }
  0xcb   :  { %177 = vmatmul.mubr.msk.f32.vlgmr.msra.gmra.mrb[0].mxu0 %vm38_vm0, %v51_v15  ;;  %v150_v16 = vmul.f32 %v52_v12, %v51_v15 }
  0xcd   :  { %v151_v22 = vsel %vm38_vm0, %v150_v16, 0.0 }
 0x19e   :  { %v132_v17 = vpop.f32.mrb[0].mxu0 }
 0x19f   :  { %v137_v18 = vmul.f32 1.442695, %v132_v17  ;;  %v178_v19 = vpop.f32.mrb[1].mxu0 }
 0x1a1   :  { %187 = vpow2.f32 %v137_v18 }
 0x1ab   :  { %v188_v20 = vpop.eup %187 }
 0x1ac   :  { %v140_v21 = vsel %vm139_vm3, %v188_v20, 0.0 }
 0x1ad   :  { %141 = vadd.xlane.f32.xlu1 %v140_v21 }
 0x1b1   :  { %152 = vadd.xlane.f32.xlu1 %v151_v22 }
 0x23a   :  { %v142_v24 = vpop.xlane.xlu1 %141 }
 0x23b   :  { %v143_v25 = vadd.f32 %v142_v24, %v136_v23 }
 0x23d   :  { %145 = vst.msk [vmem:[#allocation3] sm:$0xff] %vm57_vm1, %v143_v25 }
 0x23e   :  { %v153_v26 = vpop.xlane.xlu1 %152 }
 0x23f   :  { %154 = vst.msk [vmem:[#allocation4] sm:$0xff] %vm57_vm1, %v153_v26 }
 0x244   :  { %v158_v27 = vld [vmem:[#allocation3] sm:$0xff] }
 0x245   :  { %189 = vlog2.f32 %v158_v27 }
 0x246   :  { %v161_v30 = vld [vmem:[#allocation4] sm:$0xff] }
 0x24f   :  { %v190_v28 = vpop.eup %189 }
 0x250   :  { %v160_v29 = vmul.f32 0.6931472, %v190_v28 }
 0x252   :  { %v162_v31 = vsub.f32 %v160_v29, %v161_v30 }
 0x254   :  { %163 = vst.msk [vmem:[%s297_s2] sm:$0xff] %vm57_vm1, %v162_v31 }
 0x255   :  { %168 = vsyncpa [#allocation6], 1 }
 0x256   :  { %169 = vsyncpa [#allocation8], 1 }

</bundles_post_ra>
